<compile_context>
chip_gen: v5e
topology: v5e:2x2
jax: 0.10.0
libtpu: 0.0.40
codegen_flags: <defaults>
</compile_context>

<pallas_src>
import functools

import jax
import jax.numpy as jnp
from jax import lax
from jax.experimental import pallas as pl
from jax.experimental.pallas import tpu as pltpu

LANES = 128
ROW_ALIGN = 32             # keeps (16,128)/(32,128) bf16/int8 sublane tiling legal
MAX_TM = 2048              # rows per tile: 2048*128*4 B = 1 MiB per f32 input block
MIN_ROWS_FOR_SPLIT = 512   # enable the 2-TensorCore split for non-tiny inputs
PAD_LOGIT = -1e4           # sigmoid(PAD_LOGIT) == 0 and softplus(PAD_LOGIT) == 0 in f32
VMEM_LIMIT = 64 * 1024 * 1024


def _cdiv(a, b):
    return -(-a // b)


def _round_up(a, b):
    return _cdiv(a, b) * b


def _dice_bce_kernel(x_ref, t_ref, s_out, i_out, b_out, *,
                     tm, rows, num_tiles, tiles_per_split, has_ragged, has_dup):
    c = pl.program_id(0)            # core split
    i = pl.program_id(1)            # tile within this split

    @pl.when(i == 0)
    def _init():
        s_out[...] = jnp.zeros_like(s_out)
        i_out[...] = jnp.zeros_like(i_out)
        b_out[...] = jnp.zeros_like(b_out)

    g_un = c * tiles_per_split + i                                # unclamped tile id
    g = jnp.minimum(g_un, num_tiles - 1) if has_dup else g_un
    base_row = g * tm
    groups = tm // 8

    def fold(v):
        # Pairwise row reduction (tm,128) -> (8,128): pure VPU adds over the
        # vreg-stack axis; f32 summation error grows ~tm/8-wise, not ~tm-wise.
        return jnp.sum(v.reshape(groups, 8, LANES), axis=0)

    def accumulate(masked):
        x = x_ref[...].astype(jnp.float32)
        t = t_ref[...].astype(jnp.float32)
        if masked:
            # Rows at/after `limit` are OOB tail garbage (partial last block) or an
            # entirely duplicated tile from grid padding: replace with the sentinel
            # BEFORE the exp so Inf/NaN never reaches the sums (sentinel adds 0).
            limit = rows - base_row
            if has_dup:
                limit = jnp.where(g_un > num_tiles - 1, 0, limit)
            row_id = lax.broadcasted_iota(jnp.int32, (tm, LANES), 0)
            valid = row_id < limit
            x = jnp.where(valid, x, PAD_LOGIT)
            t = jnp.where(valid, t, 0.0)

        # One shared exp/log pair feeds the sigmoid and both BCE log terms.
        u = jnp.exp(-jnp.abs(x))                          # e^{-|x|} in (0, 1]
        denom = 1.0 + u
        sp_pos = jnp.maximum(x, 0.0) + jnp.log(denom)     # softplus(x)  == -log(1-p)
        sp_neg = sp_pos - x                               # softplus(-x) == -log(p)

        # sigmoid via EUP approx reciprocal + one Newton step (moves the divide's
        # refinement work off the VALU); |rel err| ~ seed_err^2, far below 1e-5.
        r = pl.reciprocal(denom, approx=True)
        r = r * (2.0 - denom * r)
        nonneg = x >= 0.0
        p = jnp.where(nonneg, 1.0, u) * r

        # PyTorch clamps each BCE log term at -100, and the clamp also engages when
        # the exact probability saturates to 0/1.  Saturation is derived from
        # u / denom (not from the approximate p):  p == 1 <=> x >= 0 and 1+u == 1 ;
        # p == 0 <=> x < 0 and u == 0  (TPU flush-to-zero band caveat as documented).
        term_logp = jnp.where(jnp.logical_not(nonneg) & (u == 0.0), 100.0,
                              jnp.minimum(sp_neg, 100.0))          # -log(p)
        term_log1mp = jnp.where(nonneg & (denom == 1.0), 100.0,
                                jnp.minimum(sp_pos, 100.0))        # -log(1-p)
        bce = term_log1mp + t * (term_logp - term_log1mp)

        s_out[...] += fold(p + t)      # sum(p) + sum(t)  (dice denominator)
        i_out[...] += fold(p * t)      # sum(p * t)       (dice intersection)
        b_out[...] += fold(bce)        # sum(BCE)

    mask_conds = []
    if has_ragged:
        mask_conds.append(g_un == num_tiles - 1)
    if has_dup:
        mask_conds.append(g_un > num_tiles - 1)

    if mask_conds:
        needs_mask = functools.reduce(jnp.logical_or, mask_conds)

        @pl.when(needs_mask)
        def _masked():
            accumulate(True)

        @pl.when(jnp.logical_not(needs_mask))
        def _clean():
            accumulate(False)
    else:
        accumulate(False)


def dice_bce_loss(inputs, targets, smooth=1.0):
    """Pallas TPU equivalent of DiceBCELoss.forward(inputs, targets, smooth)."""
    n = int(inputs.size)
    rows = _cdiv(n, LANES)

    # --- static tile / core-split planning (Python ints) -----------------------
    n_split = 2 if rows >= MIN_ROWS_FOR_SPLIT else 1
    tm = min(MAX_TM, _round_up(_cdiv(rows, n_split), ROW_ALIGN))
    num_tiles = _cdiv(rows, tm)
    tiles_per_split = _cdiv(num_tiles, n_split)
    has_dup = n_split * tiles_per_split > num_tiles       # padded grid step(s)
    has_ragged = num_tiles * tm > rows                    # partial last block

    # --- layout: lane-dense (rows, 128) slab; pad only the sub-128 remainder ---
    x = jnp.ravel(inputs)
    t = jnp.ravel(targets)
    slab = rows * LANES
    if slab != n:
        # Only taken when numel % 128 != 0 (sentinel values contribute exactly 0).
        # TODO(synk): a fully copy-free path for this case needs a 1-D tail handled
        # in-kernel; the row-ragged / tile-ragged cases are already copy-free.
        x = jnp.pad(x, (0, slab - n), constant_values=PAD_LOGIT)
        t = jnp.pad(t, (0, slab - n), constant_values=0)
    x = x.reshape(rows, LANES)
    t = t.reshape(rows, LANES)

    kernel = functools.partial(
        _dice_bce_kernel, tm=tm, rows=rows, num_tiles=num_tiles,
        tiles_per_split=tiles_per_split, has_ragged=has_ragged, has_dup=has_dup)

    if has_dup:
        def tile_index(c, i):
            return jnp.minimum(c * tiles_per_split + i, num_tiles - 1)
    else:
        def tile_index(c, i):
            return c * tiles_per_split + i
    in_map = lambda c, i: (tile_index(c, i), 0)

    part_shape = jax.ShapeDtypeStruct((n_split, 8, LANES), jnp.float32)
    out_spec = pl.BlockSpec((None, 8, LANES), lambda c, i: (c, 0, 0))

    s_part, i_part, b_part = pl.pallas_call(
        kernel,
        out_shape=(part_shape,) * 3,
        grid_spec=pltpu.PrefetchScalarGridSpec(
            num_scalar_prefetch=0,
            grid=(n_split, tiles_per_split),
            in_specs=[pl.BlockSpec((tm, LANES), in_map),
                      pl.BlockSpec((tm, LANES), in_map)],
            out_specs=(out_spec,) * 3,
        ),
        # TODO(synk): sweep pltpu.CORE_PARALLEL on the leading axis on v7x so the
        # 2-TensorCore split is guaranteed to engage.
        compiler_params=pltpu.CompilerParams(
            dimension_semantics=("parallel", "arbitrary"),
            vmem_limit_bytes=VMEM_LIMIT),
    )(x, t)

    sum_p_plus_t = jnp.sum(s_part)
    intersection = jnp.sum(i_part)
    bce_sum = jnp.sum(b_part)
    s = jnp.float32(smooth)
    dice_loss = 1.0 - (2.0 * intersection + s) / (sum_p_plus_t + s)
    return bce_sum / jnp.float32(n) + dice_loss


def dice_bce_loss_ref(inputs, targets, smooth=1.0):
    # Mirrors torch: sigmoid -> flatten -> dice + mean BCE (log clamped at -100).
    p = jax.nn.sigmoid(inputs.astype(jnp.float32)).ravel()
    t = targets.astype(jnp.float32).ravel()
    inter = jnp.sum(p * t)
    dice = 1.0 - (2.0 * inter + smooth) / (jnp.sum(p) + jnp.sum(t) + smooth)
    bce = jnp.mean(-(t * jnp.maximum(jnp.log(p), -100.0)
                     + (1.0 - t) * jnp.maximum(jnp.log(1.0 - p), -100.0)))
    return bce + dice


if __name__ == "__main__":
    key = jax.random.PRNGKey(0)
    cases = [
        ("small NCHW, single masked tile",            (2, 4, 16, 16),   jnp.float32),
        ("ragged numel (sub-128 remainder)",          (2, 3, 37, 41),   jnp.float32),
        ("bf16 logits pass-through",                  (2, 4, 32, 32),   jnp.bfloat16),
        ("2-way split, multi-tile, dup+ragged tail",  (2, 8, 192, 192), jnp.float32),
    ]
    for idx, (_name, shape, in_dtype) in enumerate(cases):
        k1, k2 = jax.random.split(jax.random.fold_in(key, idx))
        logits = jax.random.normal(k1, shape, dtype=jnp.float32).astype(in_dtype)
        tgts = jax.random.bernoulli(k2, 0.5, shape).astype(jnp.float32)

        loss = jax.block_until_ready(dice_bce_loss(logits, tgts, smooth=1.0))
        ref = jax.block_until_ready(dice_bce_loss_ref(logits, tgts, smooth=1.0))

        assert jnp.isfinite(loss), (_name, shape, loss)
        assert jnp.allclose(loss, ref, rtol=2e-5, atol=2e-5), (_name, shape, loss, ref)
    print("KERNEL_OK")
</pallas_src>

<mosaic_0001>
module attributes {stable_mosaic.version = 11 : i64} {
  func.func @_dice_bce_kernel(%arg0: i32, %arg1: i32, %arg2: memref<32x128xf32, #tpu.memory_space<vmem>>, %arg3: memref<32x128xf32, #tpu.memory_space<vmem>>, %arg4: memref<1x8x128xf32, #tpu.memory_space<vmem>>, %arg5: memref<1x8x128xf32, #tpu.memory_space<vmem>>, %arg6: memref<1x8x128xf32, #tpu.memory_space<vmem>>) attributes {dimension_semantics = [#tpu.dimension_semantics<parallel>, #tpu.dimension_semantics<arbitrary>], iteration_bounds = array<i64: 1, 1>, scalar_prefetch = 0 : i64, scratch_operands = 0 : i64, tpu.core_type = #tpu.core_type<tc>, window_params = [{transform_indices = @transform_0, window_bounds = array<i64: 32, 128>}, {transform_indices = @transform_1, window_bounds = array<i64: 32, 128>}, {transform_indices = @transform_2, window_bounds = array<i64: 1, 8, 128>}, {transform_indices = @transform_3, window_bounds = array<i64: 1, 8, 128>}, {transform_indices = @transform_4, window_bounds = array<i64: 1, 8, 128>}]} {
    %c0_i32 = arith.constant 0 : i32
    %0 = arith.cmpi eq, %arg1, %c0_i32 : i32
    %1 = arith.extui %0 : i1 to i32
    %c0_i32_0 = arith.constant 0 : i32
    %2 = arith.cmpi ne, %1, %c0_i32_0 : i32
    scf.if %2 {
      %cst = arith.constant 0.000000e+00 : f32
      %12 = vector.broadcast %cst : f32 to vector<8x128xf32>
      %c0 = arith.constant 0 : index
      %c0_4 = arith.constant 0 : index
      %c0_5 = arith.constant 0 : index
      %13 = vector.load %arg4[%c0, %c0_4, %c0_5] : memref<1x8x128xf32, #tpu.memory_space<vmem>>, vector<1x8x128xf32>
      %14 = vector.shape_cast %13 : vector<1x8x128xf32> to vector<8x128xf32>
      %15 = vector.shape_cast %12 : vector<8x128xf32> to vector<1x8x128xf32>
      tpu.vector_store %arg4[%c0, %c0_4, %c0_5], %15 {strides = array<i32>} : memref<1x8x128xf32, #tpu.memory_space<vmem>>, vector<1x8x128xf32>,
      %cst_6 = arith.constant 0.000000e+00 : f32
      %16 = vector.broadcast %cst_6 : f32 to vector<8x128xf32>
      %c0_7 = arith.constant 0 : index
      %c0_8 = arith.constant 0 : index
      %c0_9 = arith.constant 0 : index
      %17 = vector.load %arg5[%c0_7, %c0_8, %c0_9] : memref<1x8x128xf32, #tpu.memory_space<vmem>>, vector<1x8x128xf32>
      %18 = vector.shape_cast %17 : vector<1x8x128xf32> to vector<8x128xf32>
      %19 = vector.shape_cast %16 : vector<8x128xf32> to vector<1x8x128xf32>
      tpu.vector_store %arg5[%c0_7, %c0_8, %c0_9], %19 {strides = array<i32>} : memref<1x8x128xf32, #tpu.memory_space<vmem>>, vector<1x8x128xf32>,
      %cst_10 = arith.constant 0.000000e+00 : f32
      %20 = vector.broadcast %cst_10 : f32 to vector<8x128xf32>
      %c0_11 = arith.constant 0 : index
      %c0_12 = arith.constant 0 : index
      %c0_13 = arith.constant 0 : index
      %21 = vector.load %arg6[%c0_11, %c0_12, %c0_13] : memref<1x8x128xf32, #tpu.memory_space<vmem>>, vector<1x8x128xf32>
      %22 = vector.shape_cast %21 : vector<1x8x128xf32> to vector<8x128xf32>
      %23 = vector.shape_cast %20 : vector<8x128xf32> to vector<1x8x128xf32>
      tpu.vector_store %arg6[%c0_11, %c0_12, %c0_13], %23 {strides = array<i32>} : memref<1x8x128xf32, #tpu.memory_space<vmem>>, vector<1x8x128xf32>,
    } else {
    }
    %c1_i32 = arith.constant 1 : i32
    %3 = arith.muli %arg0, %c1_i32 : i32
    %4 = arith.addi %3, %arg1 : i32
    %c32_i32 = arith.constant 32 : i32
    %5 = arith.muli %4, %c32_i32 : i32
    %c0_i32_1 = arith.constant 0 : i32
    %6 = arith.cmpi eq, %4, %c0_i32_1 : i32
    %7 = arith.extui %6 : i1 to i32
    %c0_i32_2 = arith.constant 0 : i32
    %8 = arith.cmpi ne, %7, %c0_i32_2 : i32
    scf.if %8 {
      %c0 = arith.constant 0 : index
      %c0_4 = arith.constant 0 : index
      %12 = vector.load %arg2[%c0, %c0_4] : memref<32x128xf32, #tpu.memory_space<vmem>>, vector<32x128xf32>
      %c0_5 = arith.constant 0 : index
      %c0_6 = arith.constant 0 : index
      %13 = vector.load %arg3[%c0_5, %c0_6] : memref<32x128xf32, #tpu.memory_space<vmem>>, vector<32x128xf32>
      %c16_i32 = arith.constant 16 : i32
      %14 = arith.subi %c16_i32, %5 : i32
      %15 = tpu.iota {dimensions = array<i32: 0>} : vector<32x128xi32>
      %16 = vector.broadcast %14 : i32 to vector<32x128xi32>
      %17 = arith.cmpi slt, %15, %16 : vector<32x128xi32>
      %cst = arith.constant -1.000000e+04 : f32
      %18 = vector.broadcast %cst : f32 to vector<32x128xf32>
      %19 = arith.select %17, %12, %18 : vector<32x128xi1>, vector<32x128xf32>
      %cst_7 = arith.constant 0.000000e+00 : f32
      %20 = vector.broadcast %cst_7 : f32 to vector<32x128xf32>
      %21 = arith.select %17, %13, %20 : vector<32x128xi1>, vector<32x128xf32>
      %22 = math.absf %19 : vector<32x128xf32>
      %cst_8 = arith.constant 0.000000e+00 : f32
      %23 = vector.broadcast %cst_8 : f32 to vector<32x128xf32>
      %24 = arith.subf %23, %22 : vector<32x128xf32>
      %25 = math.exp %24 : vector<32x128xf32>
      %cst_9 = arith.constant 1.000000e+00 : f32
      %26 = vector.broadcast %cst_9 : f32 to vector<32x128xf32>
      %27 = arith.addf %26, %25 : vector<32x128xf32>
      %cst_10 = arith.constant 0.000000e+00 : f32
      %28 = vector.broadcast %cst_10 : f32 to vector<32x128xf32>
      %29 = arith.maximumf %19, %28 : vector<32x128xf32>
      %30 = math.log %27 : vector<32x128xf32>
      %31 = arith.addf %29, %30 : vector<32x128xf32>
      %32 = arith.subf %31, %19 : vector<32x128xf32>
      %33 = tpu.reciprocal %27 {approx = true} : vector<32x128xf32> -> vector<32x128xf32>
      %34 = arith.mulf %27, %33 : vector<32x128xf32>
      %cst_11 = arith.constant 2.000000e+00 : f32
      %35 = vector.broadcast %cst_11 : f32 to vector<32x128xf32>
      %36 = arith.subf %35, %34 : vector<32x128xf32>
      %37 = arith.mulf %33, %36 : vector<32x128xf32>
      %cst_12 = arith.constant 0.000000e+00 : f32
      %38 = vector.broadcast %cst_12 : f32 to vector<32x128xf32>
      %39 = arith.cmpf oge, %19, %38 : vector<32x128xf32>
      %cst_13 = arith.constant 1.000000e+00 : f32
      %40 = vector.broadcast %cst_13 : f32 to vector<32x128xf32>
      %41 = arith.select %39, %40, %25 : vector<32x128xi1>, vector<32x128xf32>
      %42 = arith.mulf %41, %37 : vector<32x128xf32>
      %cst_14 = arith.constant dense<true> : vector<32x128xi1>
      %43 = arith.xori %39, %cst_14 : vector<32x128xi1>
      %cst_15 = arith.constant 0.000000e+00 : f32
      %44 = vector.broadcast %cst_15 : f32 to vector<32x128xf32>
      %45 = arith.cmpf oeq, %25, %44 : vector<32x128xf32>
      %46 = arith.andi %43, %45 : vector<32x128xi1>
      %cst_16 = arith.constant 1.000000e+02 : f32
      %47 = vector.broadcast %cst_16 : f32 to vector<32x128xf32>
      %48 = arith.minimumf %32, %47 : vector<32x128xf32>
      %cst_17 = arith.constant 1.000000e+02 : f32
      %49 = vector.broadcast %cst_17 : f32 to vector<32x128xf32>
      %50 = arith.select %46, %49, %48 : vector<32x128xi1>, vector<32x128xf32>
      %cst_18 = arith.constant 1.000000e+00 : f32
      %51 = vector.broadcast %cst_18 : f32 to vector<32x128xf32>
      %52 = arith.cmpf oeq, %27, %51 : vector<32x128xf32>
      %53 = arith.andi %39, %52 : vector<32x128xi1>
      %cst_19 = arith.constant 1.000000e+02 : f32
      %54 = vector.broadcast %cst_19 : f32 to vector<32x128xf32>
      %55 = arith.minimumf %31, %54 : vector<32x128xf32>
      %cst_20 = arith.constant 1.000000e+02 : f32
      %56 = vector.broadcast %cst_20 : f32 to vector<32x128xf32>
      %57 = arith.select %53, %56, %55 : vector<32x128xi1>, vector<32x128xf32>
      %58 = arith.subf %50, %57 : vector<32x128xf32>
      %59 = arith.mulf %21, %58 : vector<32x128xf32>
      %60 = arith.addf %57, %59 : vector<32x128xf32>
      %c0_21 = arith.constant 0 : index
      %c0_22 = arith.constant 0 : index
      %c0_23 = arith.constant 0 : index
      %61 = vector.load %arg4[%c0_21, %c0_22, %c0_23] : memref<1x8x128xf32, #tpu.memory_space<vmem>>, vector<1x8x128xf32>
      %62 = vector.shape_cast %61 : vector<1x8x128xf32> to vector<8x128xf32>
      %63 = arith.addf %42, %21 : vector<32x128xf32>
      %64 = vector.shape_cast %63 : vector<32x128xf32> to vector<4x8x128xf32>
      %cst_24 = arith.constant dense<0.000000e+00> : vector<8x128xf32>
      %65 = vector.multi_reduction <add>, %64, %cst_24 [0] : vector<4x8x128xf32> to vector<8x128xf32>
      %66 = arith.addf %62, %65 : vector<8x128xf32>
      %c0_25 = arith.constant 0 : index
      %c0_26 = arith.constant 0 : index
      %c0_27 = arith.constant 0 : index
      %67 = vector.load %arg4[%c0_25, %c0_26, %c0_27] : memref<1x8x128xf32, #tpu.memory_space<vmem>>, vector<1x8x128xf32>
      %68 = vector.shape_cast %67 : vector<1x8x128xf32> to vector<8x128xf32>
      %69 = vector.shape_cast %66 : vector<8x128xf32> to vector<1x8x128xf32>
      tpu.vector_store %arg4[%c0_25, %c0_26, %c0_27], %69 {strides = array<i32>} : memref<1x8x128xf32, #tpu.memory_space<vmem>>, vector<1x8x128xf32>,
      %c0_28 = arith.constant 0 : index
      %c0_29 = arith.constant 0 : index
      %c0_30 = arith.constant 0 : index
      %70 = vector.load %arg5[%c0_28, %c0_29, %c0_30] : memref<1x8x128xf32, #tpu.memory_space<vmem>>, vector<1x8x128xf32>
      %71 = vector.shape_cast %70 : vector<1x8x128xf32> to vector<8x128xf32>
      %72 = arith.mulf %42, %21 : vector<32x128xf32>
      %73 = vector.shape_cast %72 : vector<32x128xf32> to vector<4x8x128xf32>
      %cst_31 = arith.constant dense<0.000000e+00> : vector<8x128xf32>
      %74 = vector.multi_reduction <add>, %73, %cst_31 [0] : vector<4x8x128xf32> to vector<8x128xf32>
      %75 = arith.addf %71, %74 : vector<8x128xf32>
      %c0_32 = arith.constant 0 : index
      %c0_33 = arith.constant 0 : index
      %c0_34 = arith.constant 0 : index
      %76 = vector.load %arg5[%c0_32, %c0_33, %c0_34] : memref<1x8x128xf32, #tpu.memory_space<vmem>>, vector<1x8x128xf32>
      %77 = vector.shape_cast %76 : vector<1x8x128xf32> to vector<8x128xf32>
      %78 = vector.shape_cast %75 : vector<8x128xf32> to vector<1x8x128xf32>
      tpu.vector_store %arg5[%c0_32, %c0_33, %c0_34], %78 {strides = array<i32>} : memref<1x8x128xf32, #tpu.memory_space<vmem>>, vector<1x8x128xf32>,
      %c0_35 = arith.constant 0 : index
      %c0_36 = arith.constant 0 : index
      %c0_37 = arith.constant 0 : index
      %79 = vector.load %arg6[%c0_35, %c0_36, %c0_37] : memref<1x8x128xf32, #tpu.memory_space<vmem>>, vector<1x8x128xf32>
      %80 = vector.shape_cast %79 : vector<1x8x128xf32> to vector<8x128xf32>
      %81 = vector.shape_cast %60 : vector<32x128xf32> to vector<4x8x128xf32>
      %cst_38 = arith.constant dense<0.000000e+00> : vector<8x128xf32>
      %82 = vector.multi_reduction <add>, %81, %cst_38 [0] : vector<4x8x128xf32> to vector<8x128xf32>
      %83 = arith.addf %80, %82 : vector<8x128xf32>
      %c0_39 = arith.constant 0 : index
      %c0_40 = arith.constant 0 : index
      %c0_41 = arith.constant 0 : index
      %84 = vector.load %arg6[%c0_39, %c0_40, %c0_41] : memref<1x8x128xf32, #tpu.memory_space<vmem>>, vector<1x8x128xf32>
      %85 = vector.shape_cast %84 : vector<1x8x128xf32> to vector<8x128xf32>
      %86 = vector.shape_cast %83 : vector<8x128xf32> to vector<1x8x128xf32>
      tpu.vector_store %arg6[%c0_39, %c0_40, %c0_41], %86 {strides = array<i32>} : memref<1x8x128xf32, #tpu.memory_space<vmem>>, vector<1x8x128xf32>,
    } else {
    }
    %true = arith.constant true
    %9 = arith.xori %6, %true : i1
    %10 = arith.extui %9 : i1 to i32
    %c0_i32_3 = arith.constant 0 : i32
    %11 = arith.cmpi ne, %10, %c0_i32_3 : i32
    scf.if %11 {
      %c0 = arith.constant 0 : index
      %c0_4 = arith.constant 0 : index
      %12 = vector.load %arg2[%c0, %c0_4] : memref<32x128xf32, #tpu.memory_space<vmem>>, vector<32x128xf32>
      %c0_5 = arith.constant 0 : index
      %c0_6 = arith.constant 0 : index
      %13 = vector.load %arg3[%c0_5, %c0_6] : memref<32x128xf32, #tpu.memory_space<vmem>>, vector<32x128xf32>
      %14 = math.absf %12 : vector<32x128xf32>
      %cst = arith.constant 0.000000e+00 : f32
      %15 = vector.broadcast %cst : f32 to vector<32x128xf32>
      %16 = arith.subf %15, %14 : vector<32x128xf32>
      %17 = math.exp %16 : vector<32x128xf32>
      %cst_7 = arith.constant 1.000000e+00 : f32
      %18 = vector.broadcast %cst_7 : f32 to vector<32x128xf32>
      %19 = arith.addf %18, %17 : vector<32x128xf32>
      %cst_8 = arith.constant 0.000000e+00 : f32
      %20 = vector.broadcast %cst_8 : f32 to vector<32x128xf32>
      %21 = arith.maximumf %12, %20 : vector<32x128xf32>
      %22 = math.log %19 : vector<32x128xf32>
      %23 = arith.addf %21, %22 : vector<32x128xf32>
      %24 = arith.subf %23, %12 : vector<32x128xf32>
      %25 = tpu.reciprocal %19 {approx = true} : vector<32x128xf32> -> vector<32x128xf32>
      %26 = arith.mulf %19, %25 : vector<32x128xf32>
      %cst_9 = arith.constant 2.000000e+00 : f32
      %27 = vector.broadcast %cst_9 : f32 to vector<32x128xf32>
      %28 = arith.subf %27, %26 : vector<32x128xf32>
      %29 = arith.mulf %25, %28 : vector<32x128xf32>
      %cst_10 = arith.constant 0.000000e+00 : f32
      %30 = vector.broadcast %cst_10 : f32 to vector<32x128xf32>
      %31 = arith.cmpf oge, %12, %30 : vector<32x128xf32>
      %cst_11 = arith.constant 1.000000e+00 : f32
      %32 = vector.broadcast %cst_11 : f32 to vector<32x128xf32>
      %33 = arith.select %31, %32, %17 : vector<32x128xi1>, vector<32x128xf32>
      %34 = arith.mulf %33, %29 : vector<32x128xf32>
      %cst_12 = arith.constant dense<true> : vector<32x128xi1>
      %35 = arith.xori %31, %cst_12 : vector<32x128xi1>
      %cst_13 = arith.constant 0.000000e+00 : f32
      %36 = vector.broadcast %cst_13 : f32 to vector<32x128xf32>
      %37 = arith.cmpf oeq, %17, %36 : vector<32x128xf32>
      %38 = arith.andi %35, %37 : vector<32x128xi1>
      %cst_14 = arith.constant 1.000000e+02 : f32
      %39 = vector.broadcast %cst_14 : f32 to vector<32x128xf32>
      %40 = arith.minimumf %24, %39 : vector<32x128xf32>
      %cst_15 = arith.constant 1.000000e+02 : f32
      %41 = vector.broadcast %cst_15 : f32 to vector<32x128xf32>
      %42 = arith.select %38, %41, %40 : vector<32x128xi1>, vector<32x128xf32>
      %cst_16 = arith.constant 1.000000e+00 : f32
      %43 = vector.broadcast %cst_16 : f32 to vector<32x128xf32>
      %44 = arith.cmpf oeq, %19, %43 : vector<32x128xf32>
      %45 = arith.andi %31, %44 : vector<32x128xi1>
      %cst_17 = arith.constant 1.000000e+02 : f32
      %46 = vector.broadcast %cst_17 : f32 to vector<32x128xf32>
      %47 = arith.minimumf %23, %46 : vector<32x128xf32>
      %cst_18 = arith.constant 1.000000e+02 : f32
      %48 = vector.broadcast %cst_18 : f32 to vector<32x128xf32>
      %49 = arith.select %45, %48, %47 : vector<32x128xi1>, vector<32x128xf32>
      %50 = arith.subf %42, %49 : vector<32x128xf32>
      %51 = arith.mulf %13, %50 : vector<32x128xf32>
      %52 = arith.addf %49, %51 : vector<32x128xf32>
      %c0_19 = arith.constant 0 : index
      %c0_20 = arith.constant 0 : index
      %c0_21 = arith.constant 0 : index
      %53 = vector.load %arg4[%c0_19, %c0_20, %c0_21] : memref<1x8x128xf32, #tpu.memory_space<vmem>>, vector<1x8x128xf32>
      %54 = vector.shape_cast %53 : vector<1x8x128xf32> to vector<8x128xf32>
      %55 = arith.addf %34, %13 : vector<32x128xf32>
      %56 = vector.shape_cast %55 : vector<32x128xf32> to vector<4x8x128xf32>
      %cst_22 = arith.constant dense<0.000000e+00> : vector<8x128xf32>
      %57 = vector.multi_reduction <add>, %56, %cst_22 [0] : vector<4x8x128xf32> to vector<8x128xf32>
      %58 = arith.addf %54, %57 : vector<8x128xf32>
      %c0_23 = arith.constant 0 : index
      %c0_24 = arith.constant 0 : index
      %c0_25 = arith.constant 0 : index
      %59 = vector.load %arg4[%c0_23, %c0_24, %c0_25] : memref<1x8x128xf32, #tpu.memory_space<vmem>>, vector<1x8x128xf32>
      %60 = vector.shape_cast %59 : vector<1x8x128xf32> to vector<8x128xf32>
      %61 = vector.shape_cast %58 : vector<8x128xf32> to vector<1x8x128xf32>
      tpu.vector_store %arg4[%c0_23, %c0_24, %c0_25], %61 {strides = array<i32>} : memref<1x8x128xf32, #tpu.memory_space<vmem>>, vector<1x8x128xf32>,
      %c0_26 = arith.constant 0 : index
      %c0_27 = arith.constant 0 : index
      %c0_28 = arith.constant 0 : index
      %62 = vector.load %arg5[%c0_26, %c0_27, %c0_28] : memref<1x8x128xf32, #tpu.memory_space<vmem>>, vector<1x8x128xf32>
      %63 = vector.shape_cast %62 : vector<1x8x128xf32> to vector<8x128xf32>
      %64 = arith.mulf %34, %13 : vector<32x128xf32>
      %65 = vector.shape_cast %64 : vector<32x128xf32> to vector<4x8x128xf32>
      %cst_29 = arith.constant dense<0.000000e+00> : vector<8x128xf32>
      %66 = vector.multi_reduction <add>, %65, %cst_29 [0] : vector<4x8x128xf32> to vector<8x128xf32>
      %67 = arith.addf %63, %66 : vector<8x128xf32>
      %c0_30 = arith.constant 0 : index
      %c0_31 = arith.constant 0 : index
      %c0_32 = arith.constant 0 : index
      %68 = vector.load %arg5[%c0_30, %c0_31, %c0_32] : memref<1x8x128xf32, #tpu.memory_space<vmem>>, vector<1x8x128xf32>
      %69 = vector.shape_cast %68 : vector<1x8x128xf32> to vector<8x128xf32>
      %70 = vector.shape_cast %67 : vector<8x128xf32> to vector<1x8x128xf32>
      tpu.vector_store %arg5[%c0_30, %c0_31, %c0_32], %70 {strides = array<i32>} : memref<1x8x128xf32, #tpu.memory_space<vmem>>, vector<1x8x128xf32>,
      %c0_33 = arith.constant 0 : index
      %c0_34 = arith.constant 0 : index
      %c0_35 = arith.constant 0 : index
      %71 = vector.load %arg6[%c0_33, %c0_34, %c0_35] : memref<1x8x128xf32, #tpu.memory_space<vmem>>, vector<1x8x128xf32>
      %72 = vector.shape_cast %71 : vector<1x8x128xf32> to vector<8x128xf32>
      %73 = vector.shape_cast %52 : vector<32x128xf32> to vector<4x8x128xf32>
      %cst_36 = arith.constant dense<0.000000e+00> : vector<8x128xf32>
      %74 = vector.multi_reduction <add>, %73, %cst_36 [0] : vector<4x8x128xf32> to vector<8x128xf32>
      %75 = arith.addf %72, %74 : vector<8x128xf32>
      %c0_37 = arith.constant 0 : index
      %c0_38 = arith.constant 0 : index
      %c0_39 = arith.constant 0 : index
      %76 = vector.load %arg6[%c0_37, %c0_38, %c0_39] : memref<1x8x128xf32, #tpu.memory_space<vmem>>, vector<1x8x128xf32>
      %77 = vector.shape_cast %76 : vector<1x8x128xf32> to vector<8x128xf32>
      %78 = vector.shape_cast %75 : vector<8x128xf32> to vector<1x8x128xf32>
      tpu.vector_store %arg6[%c0_37, %c0_38, %c0_39], %78 {strides = array<i32>} : memref<1x8x128xf32, #tpu.memory_space<vmem>>, vector<1x8x128xf32>,
    } else {
    }
    return
  }
  func.func @transform_0(%arg0: i32, %arg1: i32) -> (i32, i32) {
    %c1_i32 = arith.constant 1 : i32
    %0 = arith.muli %arg0, %c1_i32 : i32
    %1 = arith.addi %0, %arg1 : i32
    %c0_i32 = arith.constant 0 : i32
    %c0_i32_0 = arith.constant 0 : i32
    return %1, %c0_i32 : i32, i32
  }
  func.func @transform_1(%arg0: i32, %arg1: i32) -> (i32, i32) {
    %c1_i32 = arith.constant 1 : i32
    %0 = arith.muli %arg0, %c1_i32 : i32
    %1 = arith.addi %0, %arg1 : i32
    %c0_i32 = arith.constant 0 : i32
    %c0_i32_0 = arith.constant 0 : i32
    return %1, %c0_i32 : i32, i32
  }
  func.func @transform_2(%arg0: i32, %arg1: i32) -> (i32, i32, i32) {
    %c0_i32 = arith.constant 0 : i32
    %c0_i32_0 = arith.constant 0 : i32
    %c0_i32_1 = arith.constant 0 : i32
    return %arg0, %c0_i32, %c0_i32_0 : i32, i32, i32
  }
  func.func @transform_3(%arg0: i32, %arg1: i32) -> (i32, i32, i32) {
    %c0_i32 = arith.constant 0 : i32
    %c0_i32_0 = arith.constant 0 : i32
    %c0_i32_1 = arith.constant 0 : i32
    return %arg0, %c0_i32, %c0_i32_0 : i32, i32, i32
  }
  func.func @transform_4(%arg0: i32, %arg1: i32) -> (i32, i32, i32) {
    %c0_i32 = arith.constant 0 : i32
    %c0_i32_0 = arith.constant 0 : i32
    %c0_i32_1 = arith.constant 0 : i32
    return %arg0, %c0_i32, %c0_i32_0 : i32, i32, i32
  }
}

</mosaic_0001>

<bundles_post_ra>
// kernel: tpu_custom_call.1
= control target key start
LH: loop header
LB: loop body
LE: loop exit
PB: predicated region body
PF: predicated region fallthrough
CT: control target
= control target key end

     0   :  { %10 = vsyncpa [#allocation3], 0  ;;  %s727_s0 = inlined_call_operand.hbm [shape: f32[16,128], index: 0, kind: input, shape index: {}]   ;;  %s728_s1 = inlined_call_operand.hbm [shape: f32[16,128], index: 1, kind: input, shape index: {}]   ;;  %s729_s2 = inlined_call_operand.hbm [shape: f32[1,8,128], index: 2, kind: output, shape index: {0}]   ;;  %s730_s3 = inlined_call_operand.hbm [shape: f32[1,8,128], index: 3, kind: output, shape index: {1}]   ;;  %s731_s4 = inlined_call_operand.hbm [shape: f32[1,8,128], index: 4, kind: output, shape index: {2}]  }
   0x1   :  { %11 = vsyncpa [#allocation6], 0 }
   0x2   :  { %12 = vsyncpa [#allocation4], 0 }
   0x3   :  { %13 = vsyncpa [#allocation9], 0 }
   0x4   :  { %22 = vsyncadd [#allocation3], 256  ;;  %s27_s17 = sshll.u32 %s727_s0, 4  ;;  %s617_s18 = smov [#allocation2]   ;;  %s28_s17 = int_to_ptr.hbm [resolvable:$true] %s27_s17 }
   0x5   :  { %s29_s19 = sshll.u32 %s617_s18, 4  ;;  %s618_s20 = smov 128   ;;  %s30_s19 = int_to_ptr.vmem [resolvable:$true] %s29_s19 }
   0x6   :  { %s619_s21 = smov 8  }
   0x7   :  { %35 = dma.hbm_to_vmem [thread:$0]  %s28_s17, 256, %s30_s19, [#allocation3], %s618_s20, %s618_s20, %s619_s21  }
   0x8   :  { %44 = vsyncadd [#allocation6], 256  ;;  %s49_s24 = sshll.u32 %s728_s1, 4  ;;  %s620_s25 = smov [#allocation5]   ;;  %s50_s24 = int_to_ptr.hbm [resolvable:$true] %s49_s24 }
   0x9   :  { %s51_s26 = sshll.u32 %s620_s25, 4  ;;  %s52_s26 = int_to_ptr.vmem [resolvable:$true] %s51_s26 }
   0xa   :  { %57 = dma.hbm_to_vmem [thread:$0]  %s50_s24, 256, %s52_s26, [#allocation6], %s618_s20, %s618_s20, %s619_s21  }
   0xb   :  { %609 = dma.done.wait [#allocation3], 512  }
   0xc   :  { %610 = vsyncadd [#allocation3], 4294966784 }
   0xd   :  { %611 = dma.done.wait [#allocation6], 512  }
   0xe   :  { %612 = vsyncadd [#allocation6], 4294966784  ;;  %v621_v0 = vmov -14426.95   ;;  %v657_v2 = vld [vmem:[#allocation2] sm:$0xff]  ;;  %v659_v3 = vld [vmem:[#allocation2 + $0x8] sm:$0xff] }
   0xf   :  { %471 = vpow2.f32 %v621_v0  ;;  %v114_v4 = vand.u32 2147483647, %v657_v2  ;;  %v115_v5 = vand.u32 2147483647, %v659_v3  ;;  %vm170_vm0 = vcmp.ge.f32.partialorder %v657_v2, 0.0  ;;  %v91_v44 = vld [vmem:[#allocation5] sm:$0xff] }
  0x10   :  { %vm171_vm1 = vcmp.ge.f32.partialorder %v659_v3, 0.0  ;;  %v134_v25 = vmax.f32 %v657_v2, 0.0  ;;  %v135_v26 = vmax.f32 %v659_v3, 0.0  ;;  %vm622_vm4 = vmmov 1   ;;  %v92_v48 = vld [vmem:[#allocation5 + $0x8] sm:$0xff]  ;;  %s623_s0 = smov [#allocation8]  }
  0x11   :  { %v118_v7 = vsub.f32 0.0, %v114_v4  ;;  %v119_v8 = vsub.f32 0.0, %v115_v5  ;;  %vm675_vm5 = vmxor %vm170_vm0, %vm622_vm4  ;;  %s426_s1 = sshll.u32 %s623_s0, 4  ;;  %s428_s29 = sshll.u32 %s730_s3, 4  ;;  %s427_s1 = int_to_ptr.vmem [resolvable:$true] %s426_s1  ;;  %s429_s29 = int_to_ptr.hbm [resolvable:$true] %s428_s29 }
  0x12   :  { %vm683_vm8 = vmxor %vm171_vm1, %vm622_vm4  ;;  %s624_s30 = smov [#allocation7]   ;;  %s417_s8 = sshll.u32 %s729_s2, 4  ;;  %s418_s8 = int_to_ptr.hbm [resolvable:$true] %s417_s8 }
  0x13   :  { %v122_v9 = vmul.f32 1.442695, %v118_v7  ;;  %v124_v10 = vmul.f32 1.442695, %v119_v8  ;;  %s415_s5 = sshll.u32 %s624_s30, 4  ;;  %s625_s3 = smov [#allocation10]   ;;  %s416_s5 = int_to_ptr.vmem [resolvable:$true] %s415_s5 }
  0x14   :  { %s437_s9 = sshll.u32 %s625_s3, 4  ;;  %s439_s12 = sshll.u32 %s731_s4, 4  ;;  %s438_s9 = int_to_ptr.vmem [resolvable:$true] %s437_s9  ;;  %s440_s12 = int_to_ptr.hbm [resolvable:$true] %s439_s12 }
  0x15   :  { %v472_v1 = vpop.eup %471 }
  0x16   :  { %v132_v6 = vadd.f32 1.0, %v472_v1  ;;  %vm188_vm2 = vcmp.eq.f32.partialorder %v472_v1, 0.0 }
  0x18   :  { %473 = vrcp.f32 %v132_v6 }
  0x19   :  { %475 = vlog2.f32 %v132_v6 }
  0x1a   :  { %477 = vpow2.f32 %v122_v9 }
  0x1b   :  { %479 = vpow2.f32 %v124_v10 }
  0x1e   :  { %v474_v11 = vpop.eup %473 }
  0x1f   :  { %v476_v12 = vpop.eup %475  ;;  %v160_v14 = vmul.f32 %v474_v11, %v132_v6 }
  0x20   :  { %v478_v13 = vpop.eup %477  ;;  %v663_v18 = vmul.f32 0.6931472, %v476_v12 }
  0x21   :  { %v480_v15 = vpop.eup %479  ;;  %v130_v16 = vadd.f32 1.0, %v478_v13  ;;  %v164_v19 = vsub.f32 2.0, %v160_v14  ;;  %v174_v30 = vsel %vm170_vm0, 1.0, %v478_v13  ;;  %vm186_vm6 = vcmp.eq.f32.partialorder %v478_v13, 0.0 }
  0x22   :  { %v131_v17 = vadd.f32 1.0, %v480_v15  ;;  %v459_v20 = vadd.f32 10000.0, %v663_v18  ;;  %v212_v31 = vmin.f32 %v663_v18, 100.0  ;;  %v175_v40 = vsel %vm171_vm1, 1.0, %v480_v15  ;;  %vm703_vm12 = vmand %vm675_vm5, %vm186_vm6 }
  0x23   :  { %481 = vrcp.f32 %v130_v16  ;;  %v168_v21 = vmul.f32 %v474_v11, %v164_v19  ;;  %vm202_vm3 = vcmp.eq.f32.partialorder %v130_v16, 1.0  ;;  %vm187_vm9 = vcmp.eq.f32.partialorder %v480_v15, 0.0 }
  0x24   :  { %483 = vrcp.f32 %v131_v17  ;;  %v196_v27 = vmin.f32 %v459_v20, 100.0  ;;  %vm203_vm7 = vcmp.eq.f32.partialorder %v131_v17, 1.0  ;;  %vm691_vm10 = vmand %vm170_vm0, %vm202_vm3 }
  0x25   :  { %485 = vlog2.f32 %v130_v16  ;;  %v180_v34 = vmul.f32 %v472_v1, %v168_v21  ;;  %vm207_vm11 = vmand %vm171_vm1, %vm203_vm7 }
  0x26   :  { %487 = vlog2.f32 %v131_v17  ;;  %v200_v43 = vsel %vm188_vm2, 100.0, %v196_v27  ;;  %vm191_vm13 = vmand %vm683_vm8, %vm187_vm9 }
  0x27   :  { %v243_v50 = vmul.f32 0.0, %v180_v34  ;;  %v220_v57 = vsub.f32 %v200_v43, %v212_v31 }
  0x29   :  { %v482_v22 = vpop.eup %481  ;;  %v224_v8 = vmul.f32 0.0, %v220_v57 }
  0x2a   :  { %v484_v23 = vpop.eup %483  ;;  %v158_v24 = vmul.f32 %v482_v22, %v130_v16 }
  0x2b   :  { %v486_v28 = vpop.eup %485  ;;  %v159_v29 = vmul.f32 %v484_v23, %v131_v17  ;;  %v228_v17 = vadd.f32 %v224_v8, %v212_v31 }
  0x2c   :  { %v488_v32 = vpop.eup %487  ;;  %v162_v33 = vsub.f32 2.0, %v158_v24  ;;  %v139_v35 = vmul.f32 0.6931472, %v486_v28 }
  0x2d   :  { %v163_v36 = vsub.f32 2.0, %v159_v29  ;;  %v141_v37 = vmul.f32 0.6931472, %v488_v32 }
  0x2e   :  { %v166_v39 = vmul.f32 %v482_v22, %v162_v33  ;;  %v146_v41 = vadd.f32 %v139_v35, %v134_v25 }
  0x2f   :  { %v167_v45 = vmul.f32 %v484_v23, %v163_v36  ;;  %v147_v46 = vadd.f32 %v141_v37, %v135_v26 }
  0x30   :  { %v178_v49 = vmul.f32 %v174_v30, %v166_v39  ;;  %v150_v51 = vsub.f32 %v146_v41, %v657_v2  ;;  %v210_v52 = vmin.f32 %v146_v41, 100.0 }
  0x31   :  { %v179_v53 = vmul.f32 %v175_v40, %v167_v45  ;;  %v151_v54 = vsub.f32 %v147_v46, %v659_v3  ;;  %v211_v56 = vmin.f32 %v147_v46, 100.0 }
  0x32   :  { %v241_v58 = vmul.f32 %v178_v49, %v91_v44  ;;  %v231_v59 = vadd.f32 %v178_v49, %v91_v44  ;;  %v194_v60 = vmin.f32 %v150_v51, 100.0  ;;  %v214_v61 = vsel %vm691_vm10, 100.0, %v210_v52 }
  0x33   :  { %v242_v62 = vmul.f32 %v179_v53, %v92_v48  ;;  %v232_v63 = vadd.f32 %v179_v53, %v92_v48  ;;  %v195_v0 = vmin.f32 %v151_v54, 100.0  ;;  %v215_v1 = vsel %vm207_vm11, 100.0, %v211_v56 }
  0x34   :  { %v198_v2 = vsel %vm703_vm12, 100.0, %v194_v60 }
  0x35   :  { %v245_v3 = vadd.f32 %v242_v62, %v241_v58  ;;  %v235_v4 = vadd.f32 %v232_v63, %v231_v59  ;;  %v199_v5 = vsel %vm191_vm13, 100.0, %v195_v0  ;;  %v218_v6 = vsub.f32 %v198_v2, %v214_v61 }
  0x36   :  { %v219_v7 = vsub.f32 %v199_v5, %v215_v1 }
  0x37   :  { %v246_v9 = vadd.f32 %v245_v3, %v243_v50  ;;  %v236_v10 = vadd.f32 %v235_v4, %v180_v34  ;;  %v222_v11 = vmul.f32 %v218_v6, %v91_v44 }
  0x38   :  { %v223_v12 = vmul.f32 %v219_v7, %v92_v48 }
  0x39   :  { %v247_v13 = vadd.f32 %v246_v9, %v243_v50  ;;  %v237_v14 = vadd.f32 %v236_v10, %v180_v34  ;;  %v226_v15 = vadd.f32 %v222_v11, %v214_v61 }
  0x3a   :  { %v227_v16 = vadd.f32 %v223_v12, %v215_v1 }
  0x3b   :  { %249 = vst [vmem:[#allocation8] sm:$0xff] %v247_v13 }
  0x3c   :  { %v251_v19 = vadd.f32 %v227_v16, %v226_v15  ;;  %239 = vst [vmem:[#allocation7] sm:$0xff] %v237_v14  ;;  %431 = dma.vmem_to_hbm [thread:$0]  %s427_s1, 128, %s429_s29, [#allocation9]  }
  0x3d   :  { %420 = dma.vmem_to_hbm [thread:$0]  %s416_s5, 128, %s418_s8, [#allocation4]  }
  0x3e   :  { %v252_v20 = vadd.f32 %v251_v19, %v228_v17 }
  0x40   :  { %v253_v21 = vadd.f32 %v252_v20, %v228_v17 }
  0x42   :  { %255 = vst [vmem:[#allocation10] sm:$0xff] %v253_v21 }
  0x43   :  { %442 = dma.vmem_to_hbm [thread:$0]  %s438_s9, 128, %s440_s12, [#allocation9]  }
  0x44   :  { %613 = dma.done.wait [#allocation4], 128  }
  0x45   :  { %614 = vsyncadd [#allocation4], 4294967168 }
  0x46   :  { %615 = dma.done.wait [#allocation9], 256  }
  0x47   :  { %616 = vsyncadd [#allocation9], 4294967040 }
  0x48   :  { %455 = vsyncpa [#allocation3], 1 }
  0x49   :  { %456 = vsyncpa [#allocation6], 1 }
  0x4a   :  { %457 = vsyncpa [#allocation4], 1 }
  0x4b   :  { %458 = vsyncpa [#allocation9], 1 }

</bundles_post_ra>
